<compile_context>
chip_gen: v7x
topology: tpu7x:2x2x1
jax: 0.10.0
libtpu: 0.0.40
codegen_flags: <defaults>
</compile_context>

<pallas_src>
from functools import partial

import jax
import jax.numpy as jnp
from jax.experimental import pallas as pl
from jax.experimental.pallas import tpu as pltpu


def _round_up(x, m):
    return ((x + m - 1) // m) * m


# --------------------------------------------------------------------------
# Kernel
# --------------------------------------------------------------------------
def make_mlp_kernel(n_layers, n_actions, dueling):
    """Kernel over one batch tile (batch on the lane axis).

    Ref order:
      xT    (input_size, TB)        bf16
      w0    (PADW, input_size)      bf16   fused first-layer weight (torch layout)
      wrest (n_layers-1, PADW, PADW) bf16  fused block-diagonal weights
      bias  (n_layers, PADW, 1)     f32
      qT    (OUT_ROWS, TB)          f32    value in row 0 (dueling), adv rows follow
    """
    n_rest = n_layers - 1  # >= 1 (num_hidden_layers >= 1)

    def kernel(x_ref, w0_ref, wrest_ref, b_ref, q_ref):
        # Layer 0: (PADW, in) @ (in, TB) on the MXU, f32 accumulation.
        h = jnp.dot(w0_ref[...], x_ref[...], preferred_element_type=jnp.float32)
        h = h + b_ref[0]                       # (PADW,1) lane-broadcast
        h = h * jax.nn.sigmoid(h)              # SiLU in f32 (EUP exp + VPU mul)

        # Fused block-diagonal hidden layers.
        for l in range(n_rest - 1):
            h = jnp.dot(wrest_ref[l], h.astype(jnp.bfloat16),
                        preferred_element_type=jnp.float32) + b_ref[l + 1]
            h = h * jax.nn.sigmoid(h)

        # Final fused layer: value -> row 0, advantage -> rows [1, A+1).
        fused = jnp.dot(wrest_ref[n_rest - 1], h.astype(jnp.bfloat16),
                        preferred_element_type=jnp.float32) + b_ref[n_layers - 1]

        if dueling:
            row = jax.lax.broadcasted_iota(jnp.int32, fused.shape, 0)
            adv_mask = (row >= 1) & (row < n_actions + 1)
            adv_sum = jnp.sum(jnp.where(adv_mask, fused, 0.0),
                              axis=0, keepdims=True)
            adv_mean = adv_sum * (1.0 / n_actions)
            value = fused[0:1, :]              # offset-0 sublane slice, (1, TB)
            q = fused + value - adv_mean
        else:
            q = fused                          # padded rows are exactly zero

        # Lane-dense store of only the rows the wrapper needs.
        q_ref[...] = q[: q_ref.shape[0], :].astype(q_ref.dtype)

    return kernel


# --------------------------------------------------------------------------
# Parameter init (torch convention) / packing
# --------------------------------------------------------------------------
def init_mlp_params(key, n_actions, input_size, hidden_size,
                    num_hidden_layers=1, dueling_dqn=True):
    """Xavier-normal weights in torch (out, in) layout (bf16), zero f32 biases."""
    def branch(key, out_dim):
        dims = [input_size] + [hidden_size] * num_hidden_layers + [out_dim]
        ws, bs = [], []
        for i in range(len(dims) - 1):
            key, sub = jax.random.split(key)
            fan_in, fan_out = dims[i], dims[i + 1]
            std = (2.0 / (fan_in + fan_out)) ** 0.5
            w = std * jax.random.normal(sub, (fan_out, fan_in), jnp.float32)
            ws.append(w.astype(jnp.bfloat16))
            bs.append(jnp.zeros((fan_out,), jnp.float32))
        return key, ws, bs

    key, adv_w, adv_b = branch(key, n_actions)
    if dueling_dqn:
        key, val_w, val_b = branch(key, 1)
    else:
        val_w, val_b = [], []
    return adv_w, adv_b, val_w, val_b


def pack_fused_params(adv_w, adv_b, val_w, val_b, n_actions, hidden_size, dueling):
    """Fuse both branches into one padded weight stack (transposed layout).

    Hidden features: advantage in rows [0, H), value in rows [H, 2H).
    Final layer:     value output -> row 0, advantages -> rows [1, A+1)
                     (non-dueling: advantages -> rows [0, A)).
    """
    H, A = hidden_size, n_actions
    n_layers = len(adv_w)
    assert n_layers >= 2, "num_hidden_layers must be >= 1"
    input_size = adv_w[0].shape[1]
    span = 2 * H if dueling else H
    padw = _round_up(max(span, A + (1 if dueling else 0)), 128)
    a_off = 1 if dueling else 0  # row offset of the advantage outputs

    w0 = jnp.zeros((padw, input_size), jnp.float32)
    wrest = jnp.zeros((n_layers - 1, padw, padw), jnp.float32)
    biases = jnp.zeros((n_layers, padw, 1), jnp.float32)

    # Advantage branch.
    w0 = w0.at[:H, :].set(adv_w[0].astype(jnp.float32))
    biases = biases.at[0, :H, 0].set(adv_b[0])
    for l in range(1, n_layers - 1):
        wrest = wrest.at[l - 1, :H, :H].set(adv_w[l].astype(jnp.float32))
        biases = biases.at[l, :H, 0].set(adv_b[l])
    wrest = wrest.at[n_layers - 2, a_off:a_off + A, :H].set(
        adv_w[-1].astype(jnp.float32))
    biases = biases.at[n_layers - 1, a_off:a_off + A, 0].set(adv_b[-1])

    # Value branch (block-diagonal; final output -> row 0).
    if dueling:
        w0 = w0.at[H:2 * H, :].set(val_w[0].astype(jnp.float32))
        biases = biases.at[0, H:2 * H, 0].set(val_b[0])
        for l in range(1, n_layers - 1):
            wrest = wrest.at[l - 1, H:2 * H, H:2 * H].set(val_w[l].astype(jnp.float32))
            biases = biases.at[l, H:2 * H, 0].set(val_b[l])
        wrest = wrest.at[n_layers - 2, 0:1, H:2 * H].set(val_w[-1].astype(jnp.float32))
        biases = biases.at[n_layers - 1, 0:1, 0].set(val_b[-1])

    return w0.astype(jnp.bfloat16), wrest.astype(jnp.bfloat16), biases


# --------------------------------------------------------------------------
# Forward wrapper
# --------------------------------------------------------------------------
@partial(jax.jit, static_argnames=("n_actions", "dueling_dqn", "block_batch"))
def mlp_forward(x, w0, wrest, biases, *, n_actions, dueling_dqn=True,
                block_batch=2048):
    batch, input_size = x.shape
    padw = w0.shape[0]
    n_layers = biases.shape[0]
    row_off = 1 if dueling_dqn else 0
    out_rows = _round_up(n_actions + row_off, 8)   # tiny output slab

    # Batch tile (lane axis): either one full-extent block (small batch) or a
    # multiple of 128 chosen so the grid has >= 2 steps (v7x megacore) while
    # staying <= block_batch. Ragged last block is handled by Pallas.
    if batch <= 128:
        tb = batch
    else:
        bb = max(128, (block_batch // 128) * 128)
        tb = min(bb, _round_up(pl.cdiv(batch, 2), 128))
    grid = (pl.cdiv(batch, tb),)

    # Layout plumbing only: cast+transpose fuse into one tiny XLA op over
    # input_size rows (replaces the old full pad+cast pass over x).
    x_t = x.astype(jnp.bfloat16).T                 # (input_size, batch)

    kernel = make_mlp_kernel(n_layers, n_actions, dueling_dqn)

    q_t = pl.pallas_call(
        kernel,
        out_shape=jax.ShapeDtypeStruct((out_rows, batch), jnp.float32),
        grid_spec=pltpu.PrefetchScalarGridSpec(
            num_scalar_prefetch=0,
            grid=grid,
            in_specs=[
                pl.BlockSpec((input_size, tb), lambda i: (0, i)),        # x^T tile
                pl.BlockSpec((padw, input_size), lambda i: (0, 0)),      # W0 (resident)
                pl.BlockSpec((n_layers - 1, padw, padw),
                             lambda i: (0, 0, 0)),                       # fused W stack
                pl.BlockSpec((n_layers, padw, 1), lambda i: (0, 0, 0)),  # bias stack
            ],
            out_specs=pl.BlockSpec((out_rows, tb), lambda i: (0, i)),
        ),
        compiler_params=pltpu.CompilerParams(
            dimension_semantics=("parallel",),       # megacore across batch tiles
            vmem_limit_bytes=32 * 1024 * 1024,       # safe on v5e/v6e/v7x
        ),
    )(x_t, w0, wrest, biases)

    # Tiny (out_rows, batch) slab -> (batch, n_actions).
    return q_t[row_off:row_off + n_actions, :].T


# --------------------------------------------------------------------------
# Pure-JAX reference (f32 math, same parameter values)
# --------------------------------------------------------------------------
def mlp_reference(x, adv_w, adv_b, val_w, val_b, dueling_dqn=True):
    def branch(ws, bs):
        h = x.astype(jnp.float32)
        for i, (w, b) in enumerate(zip(ws, bs)):
            h = h @ w.astype(jnp.float32).T + b
            if i < len(ws) - 1:
                h = h * jax.nn.sigmoid(h)
        return h

    adv = branch(adv_w, adv_b)
    if dueling_dqn:
        val = branch(val_w, val_b)
        return val + adv - jnp.mean(adv, axis=-1, keepdims=True)
    return adv


if __name__ == "__main__":
    batch = 2
    n_actions = 4
    input_size = 16
    hidden_size = 32
    num_hidden_layers = 2
    dueling_dqn = True

    key = jax.random.PRNGKey(0)
    key, xkey = jax.random.split(key)
    x = jax.random.normal(xkey, (batch, input_size), jnp.float32)

    adv_w, adv_b, val_w, val_b = init_mlp_params(
        key, n_actions, input_size, hidden_size,
        num_hidden_layers=num_hidden_layers, dueling_dqn=dueling_dqn)

    w0, wrest, biases = pack_fused_params(
        adv_w, adv_b, val_w, val_b, n_actions, hidden_size, dueling_dqn)

    q = mlp_forward(x, w0, wrest, biases,
                    n_actions=n_actions, dueling_dqn=dueling_dqn)
    q = jax.block_until_ready(q)

    q_ref = mlp_reference(x, adv_w, adv_b, val_w, val_b, dueling_dqn)

    assert q.shape == (batch, n_actions)
    # bf16 MXU feeds -> compare with a bf16-appropriate tolerance.
    assert jnp.allclose(q, q_ref, atol=2e-2, rtol=2e-2), \
        f"max abs err {jnp.max(jnp.abs(q - q_ref))}"

    print("KERNEL_OK")
</pallas_src>

<mosaic_0001>
module attributes {stable_mosaic.version = 11 : i64} {
  func.func @kernel(%arg0: i32, %arg1: memref<16x2xbf16, #tpu.memory_space<vmem>>, %arg2: memref<128x16xbf16, #tpu.memory_space<vmem>>, %arg3: memref<2x128x128xbf16, #tpu.memory_space<vmem>>, %arg4: memref<3x128x1xf32, #tpu.memory_space<vmem>>, %arg5: memref<8x2xf32, #tpu.memory_space<vmem>>) attributes {dimension_semantics = [#tpu.dimension_semantics<parallel>], iteration_bounds = array<i64: 1>, scalar_prefetch = 0 : i64, scratch_operands = 0 : i64, tpu.core_type = #tpu.core_type<tc>, window_params = [{transform_indices = @transform_0, window_bounds = array<i64: 16, 2>}, {pipeline_mode = #tpu.pipeline_mode<synchronous>, transform_indices = @transform_1, window_bounds = array<i64: 128, 16>}, {pipeline_mode = #tpu.pipeline_mode<synchronous>, transform_indices = @transform_2, window_bounds = array<i64: 2, 128, 128>}, {pipeline_mode = #tpu.pipeline_mode<synchronous>, transform_indices = @transform_3, window_bounds = array<i64: 3, 128, 1>}, {transform_indices = @transform_4, window_bounds = array<i64: 8, 2>}]} {
    %c0 = arith.constant 0 : index
    %c0_0 = arith.constant 0 : index
    %0 = vector.load %arg2[%c0, %c0_0] : memref<128x16xbf16, #tpu.memory_space<vmem>>, vector<128x16xbf16>
    %c0_1 = arith.constant 0 : index
    %c0_2 = arith.constant 0 : index
    %1 = vector.load %arg1[%c0_1, %c0_2] : memref<16x2xbf16, #tpu.memory_space<vmem>>, vector<16x2xbf16>
    %cst = arith.constant dense<0.000000e+00> : vector<128x2xf32>
    %2 = tpu.matmul %0, %1, %cst {dimension_numbers = #tpu.dot_dimension_numbers<[1], [0], [0], [1], [0, 0, 1, 1], [], []>} : vector<128x16xbf16>, vector<16x2xbf16>, vector<128x2xf32> -> vector<128x2xf32>
    %c0_3 = arith.constant 0 : index
    %c0_4 = arith.constant 0 : index
    %c0_5 = arith.constant 0 : index
    %3 = vector.load %arg4[%c0_3, %c0_4, %c0_5] : memref<3x128x1xf32, #tpu.memory_space<vmem>>, vector<1x128x1xf32>
    %4 = vector.shape_cast %3 : vector<1x128x1xf32> to vector<128x1xf32>
    %5 = vector.broadcast %4 : vector<128x1xf32> to vector<128x2xf32>
    %6 = arith.addf %2, %5 : vector<128x2xf32>
    %7 = arith.negf %6 : vector<128x2xf32>
    %8 = math.exp %7 : vector<128x2xf32>
    %cst_6 = arith.constant 1.000000e+00 : f32
    %9 = vector.broadcast %cst_6 : f32 to vector<128x2xf32>
    %10 = arith.addf %9, %8 : vector<128x2xf32>
    %11 = arith.divf %9, %10 : vector<128x2xf32>
    %12 = arith.mulf %6, %11 : vector<128x2xf32>
    %c0_7 = arith.constant 0 : index
    %c0_8 = arith.constant 0 : index
    %c0_9 = arith.constant 0 : index
    %13 = vector.load %arg3[%c0_7, %c0_8, %c0_9] : memref<2x128x128xbf16, #tpu.memory_space<vmem>>, vector<1x128x128xbf16>
    %14 = vector.shape_cast %13 : vector<1x128x128xbf16> to vector<128x128xbf16>
    %15 = arith.truncf %12 : vector<128x2xf32> to vector<128x2xbf16>
    %cst_10 = arith.constant dense<0.000000e+00> : vector<128x2xf32>
    %16 = tpu.matmul %14, %15, %cst_10 {dimension_numbers = #tpu.dot_dimension_numbers<[1], [0], [0], [1], [0, 0, 1, 1], [], []>} : vector<128x128xbf16>, vector<128x2xbf16>, vector<128x2xf32> -> vector<128x2xf32>
    %c1 = arith.constant 1 : index
    %c0_11 = arith.constant 0 : index
    %c0_12 = arith.constant 0 : index
    %17 = vector.load %arg4[%c1, %c0_11, %c0_12] : memref<3x128x1xf32, #tpu.memory_space<vmem>>, vector<1x128x1xf32>
    %18 = vector.shape_cast %17 : vector<1x128x1xf32> to vector<128x1xf32>
    %19 = vector.broadcast %18 : vector<128x1xf32> to vector<128x2xf32>
    %20 = arith.addf %16, %19 : vector<128x2xf32>
    %21 = arith.negf %20 : vector<128x2xf32>
    %22 = math.exp %21 : vector<128x2xf32>
    %cst_13 = arith.constant 1.000000e+00 : f32
    %23 = vector.broadcast %cst_13 : f32 to vector<128x2xf32>
    %24 = arith.addf %23, %22 : vector<128x2xf32>
    %25 = arith.divf %23, %24 : vector<128x2xf32>
    %26 = arith.mulf %20, %25 : vector<128x2xf32>
    %c1_14 = arith.constant 1 : index
    %c0_15 = arith.constant 0 : index
    %c0_16 = arith.constant 0 : index
    %27 = vector.load %arg3[%c1_14, %c0_15, %c0_16] : memref<2x128x128xbf16, #tpu.memory_space<vmem>>, vector<1x128x128xbf16>
    %28 = vector.shape_cast %27 : vector<1x128x128xbf16> to vector<128x128xbf16>
    %29 = arith.truncf %26 : vector<128x2xf32> to vector<128x2xbf16>
    %cst_17 = arith.constant dense<0.000000e+00> : vector<128x2xf32>
    %30 = tpu.matmul %28, %29, %cst_17 {dimension_numbers = #tpu.dot_dimension_numbers<[1], [0], [0], [1], [0, 0, 1, 1], [], []>} : vector<128x128xbf16>, vector<128x2xbf16>, vector<128x2xf32> -> vector<128x2xf32>
    %c2 = arith.constant 2 : index
    %c0_18 = arith.constant 0 : index
    %c0_19 = arith.constant 0 : index
    %31 = vector.load %arg4[%c2, %c0_18, %c0_19] : memref<3x128x1xf32, #tpu.memory_space<vmem>>, vector<1x128x1xf32>
    %32 = vector.shape_cast %31 : vector<1x128x1xf32> to vector<128x1xf32>
    %33 = vector.broadcast %32 : vector<128x1xf32> to vector<128x2xf32>
    %34 = arith.addf %30, %33 : vector<128x2xf32>
    %35 = tpu.iota {dimensions = array<i32: 0>} : vector<128x2xi32>
    %c1_i32 = arith.constant 1 : i32
    %36 = vector.broadcast %c1_i32 : i32 to vector<128x2xi32>
    %37 = arith.cmpi sge, %35, %36 : vector<128x2xi32>
    %c5_i32 = arith.constant 5 : i32
    %38 = vector.broadcast %c5_i32 : i32 to vector<128x2xi32>
    %39 = arith.cmpi slt, %35, %38 : vector<128x2xi32>
    %40 = arith.andi %37, %39 : vector<128x2xi1>
    %cst_20 = arith.constant 0.000000e+00 : f32
    %41 = vector.broadcast %cst_20 : f32 to vector<128x2xf32>
    %42 = arith.select %40, %34, %41 : vector<128x2xi1>, vector<128x2xf32>
    %cst_21 = arith.constant dense<0.000000e+00> : vector<2xf32>
    %43 = vector.multi_reduction <add>, %42, %cst_21 [0] : vector<128x2xf32> to vector<2xf32>
    %44 = vector.shape_cast %43 : vector<2xf32> to vector<1x2xf32>
    %cst_22 = arith.constant 2.500000e-01 : f32
    %45 = vector.broadcast %cst_22 : f32 to vector<1x2xf32>
    %46 = arith.mulf %44, %45 : vector<1x2xf32>
    %47 = vector.extract_strided_slice %34 {offsets = [0, 0], sizes = [1, 2], strides = [1, 1]} : vector<128x2xf32> to vector<1x2xf32>
    %48 = vector.broadcast %47 : vector<1x2xf32> to vector<128x2xf32>
    %49 = arith.addf %34, %48 : vector<128x2xf32>
    %50 = vector.broadcast %46 : vector<1x2xf32> to vector<128x2xf32>
    %51 = arith.subf %49, %50 : vector<128x2xf32>
    %52 = vector.extract_strided_slice %51 {offsets = [0, 0], sizes = [8, 2], strides = [1, 1]} : vector<128x2xf32> to vector<8x2xf32>
    %c0_23 = arith.constant 0 : index
    %c0_24 = arith.constant 0 : index
    %53 = vector.load %arg5[%c0_23, %c0_24] : memref<8x2xf32, #tpu.memory_space<vmem>>, vector<8x2xf32>
    tpu.vector_store %arg5[%c0_23, %c0_24], %52 {strides = array<i32>} : memref<8x2xf32, #tpu.memory_space<vmem>>, vector<8x2xf32>,
    return
  }
  func.func @transform_0(%arg0: i32) -> (i32, i32) {
    %c0_i32 = arith.constant 0 : i32
    %c0_i32_0 = arith.constant 0 : i32
    return %c0_i32, %arg0 : i32, i32
  }
  func.func @transform_1(%arg0: i32) -> (i32, i32) {
    %c0_i32 = arith.constant 0 : i32
    %c0_i32_0 = arith.constant 0 : i32
    %c0_i32_1 = arith.constant 0 : i32
    return %c0_i32, %c0_i32_0 : i32, i32
  }
  func.func @transform_2(%arg0: i32) -> (i32, i32, i32) {
    %c0_i32 = arith.constant 0 : i32
    %c0_i32_0 = arith.constant 0 : i32
    %c0_i32_1 = arith.constant 0 : i32
    %c0_i32_2 = arith.constant 0 : i32
    return %c0_i32, %c0_i32_0, %c0_i32_1 : i32, i32, i32
  }
  func.func @transform_3(%arg0: i32) -> (i32, i32, i32) {
    %c0_i32 = arith.constant 0 : i32
    %c0_i32_0 = arith.constant 0 : i32
    %c0_i32_1 = arith.constant 0 : i32
    %c0_i32_2 = arith.constant 0 : i32
    return %c0_i32, %c0_i32_0, %c0_i32_1 : i32, i32, i32
  }
  func.func @transform_4(%arg0: i32) -> (i32, i32) {
    %c0_i32 = arith.constant 0 : i32
    %c0_i32_0 = arith.constant 0 : i32
    return %c0_i32, %arg0 : i32, i32
  }
}

</mosaic_0001>

<bundles_post_ra>
// kernel: mlp_forward.1
= control target key start
LH: loop header
LB: loop body
LE: loop exit
PB: predicated region body
PF: predicated region fallthrough
CT: control target
= control target key end

     0   :  { %vm178_vm0 = vcmask 130048   ;;  %v1580_v1 = vmov 0   ;;  %vm1138_vm4 = vcmask 15360   ;;  %s1921_s0 = inlined_call_operand.vmem [shape: bf16[16,2], index: 0, kind: input, shape index: {}]   ;;  %s1922_s1 = inlined_call_operand.vmem [shape: bf16[128,16], index: 1, kind: input, shape index: {}]   ;;  %s1923_s3 = inlined_call_operand.vmem [shape: f32[3,128,1], index: 3, kind: input, shape index: {}]   ;;  %s1924_s2 = inlined_call_operand.vmem [shape: bf16[2,128,128], index: 2, kind: input, shape index: {}]   ;;  %s1925_s4 = inlined_call_operand.vmem [shape: f32[8,2], index: 4, kind: output, shape index: {}]  }
   0x1   :  { %v1427_v0 = vld [vmem:[%s1921_s0] sm:$0xff]   ;;  %1425 = vset.pattern.permute.xlu0 %v1580_v1  ;;  %1426 = vset.pattern.permute.xlu1 %v1580_v1  ;;  %v1429_v3 = vld [vmem:[%s1922_s1 + $0x8] sm:$0xff]   ;;  %v1430_v4 = vld [vmem:[%s1922_s1 + $0x10] sm:$0xff]  }
   0x2   :  { %v1428_v2 = vld [vmem:[%s1922_s1] sm:$0xff]   ;;  %1342 = vmatprep.subr.bf16.mxu0 %v1427_v0  ;;  %v37_v6 = vld [vmem:[%s1923_s3 + $0x8] sm:$0xff]  ;;  %v38_v7 = vld [vmem:[%s1923_s3 + $0x10] sm:$0xff] }
   0x3   :  { %1343 = vmatpush3.bf16.msra.mxu0 %v1427_v0  ;;  %1344 = vmatprep.mubr.msk.bf16.mxu0 %vm178_vm0, %v1428_v2  ;;  %v36_v5 = vld [vmem:[%s1923_s3] sm:$0xff]  ;;  %v1431_v8 = vld [vmem:[%s1922_s1 + $0x18] sm:$0xff]   ;;  %v41_v12 = vld [vmem:[%s1923_s3 + $0x28] sm:$0xff] }
   0x4   :  { %54 = vperm.xlu0 %1425, %v36_v5   ;;  %64 = vperm.xlu1 %1426, %v38_v7   ;;  %v1432_v9 = vld [vmem:[%s1922_s1 + $0x20] sm:$0xff]   ;;  %v39_v10 = vld [vmem:[%s1923_s3 + $0x18] sm:$0xff]  ;;  %v42_v13 = vld [vmem:[%s1923_s3 + $0x30] sm:$0xff] }
   0x5   :  { %v40_v11 = vld [vmem:[%s1923_s3 + $0x20] sm:$0xff]  ;;  %v1433_v14 = vld [vmem:[%s1922_s1 + $0x28] sm:$0xff]   ;;  %v1434_v15 = vld [vmem:[%s1922_s1 + $0x30] sm:$0xff]  }
   0x6   :  { %1345 = vmatmul.mubr.msk.bf16.vlgmr.msra.gmra.mrb[0].mxu0 %vm178_vm0, %v1429_v3  ;;  %v43_v16 = vld [vmem:[%s1923_s3 + $0x38] sm:$0xff]  ;;  %v44_v17 = vld [vmem:[%s1923_s3 + $0x40] sm:$0xff]  ;;  %v45_v18 = vld [vmem:[%s1923_s3 + $0x48] sm:$0xff] }
   0x7   :  { %1348 = vmatprep.mubr.msk.bf16.mxu0 %vm178_vm0, %v1430_v4  ;;  %v46_v19 = vld [vmem:[%s1923_s3 + $0x50] sm:$0xff]  ;;  %v1435_v20 = vld [vmem:[%s1922_s1 + $0x38] sm:$0xff]   ;;  %v48_v22 = vld [vmem:[%s1923_s3 + $0x60] sm:$0xff] }
   0x8   :  { %59 = vperm.xlu0 %1425, %v37_v6   ;;  %69 = vperm.xlu1 %1426, %v39_v10   ;;  %v47_v21 = vld [vmem:[%s1923_s3 + $0x58] sm:$0xff]  ;;  %v49_v23 = vld [vmem:[%s1923_s3 + $0x68] sm:$0xff]  ;;  %v50_v24 = vld [vmem:[%s1923_s3 + $0x70] sm:$0xff] }
   0x9   :  { %v51_v25 = vld [vmem:[%s1923_s3 + $0x78] sm:$0xff]  ;;  %v1221_v26 = vld [vmem:[%s1923_s3 + $0x80] sm:$0xff]  ;;  %v1222_v27 = vld [vmem:[%s1923_s3 + $0x88] sm:$0xff] }
   0xa   :  { %v1223_v28 = vld [vmem:[%s1923_s3 + $0x90] sm:$0xff]  ;;  %v1224_v29 = vld [vmem:[%s1923_s3 + $0x98] sm:$0xff]  ;;  %v1225_v30 = vld [vmem:[%s1923_s3 + $0xa0] sm:$0xff] }
   0xb   :  { %v1226_v31 = vld [vmem:[%s1923_s3 + $0xa8] sm:$0xff]  ;;  %v1227_v32 = vld [vmem:[%s1923_s3 + $0xb0] sm:$0xff]  ;;  %v1228_v33 = vld [vmem:[%s1923_s3 + $0xb8] sm:$0xff] }
   0xc   :  { %74 = vperm.xlu0 %1425, %v40_v11   ;;  %79 = vperm.xlu1 %1426, %v41_v12   ;;  %v1229_v34 = vld [vmem:[%s1923_s3 + $0xc0] sm:$0xff]  ;;  %v1230_v35 = vld [vmem:[%s1923_s3 + $0xc8] sm:$0xff]  ;;  %v1231_v36 = vld [vmem:[%s1923_s3 + $0xd0] sm:$0xff] }
   0xd   :  { %v1232_v37 = vld [vmem:[%s1923_s3 + $0xd8] sm:$0xff]  ;;  %v1233_v38 = vld [vmem:[%s1923_s3 + $0xe0] sm:$0xff]  ;;  %v1234_v39 = vld [vmem:[%s1923_s3 + $0xe8] sm:$0xff] }
   0xe   :  { %1349 = vmatmul.mubr.msk.bf16.gmra.mrb[4].mxu0 %vm178_vm0, %v1431_v8  ;;  %v1235_v40 = vld [vmem:[%s1923_s3 + $0xf0] sm:$0xff]  ;;  %v1236_v41 = vld [vmem:[%s1923_s3 + $0xf8] sm:$0xff]  ;;  %v1277_v42 = vld [vmem:[%s1923_s3 + $0x100] sm:$0xff] }
   0xf   :  { %1352 = vmatprep.mubr.msk.bf16.mxu0 %vm178_vm0, %v1432_v9  ;;  %v1436_v43 = vld [vmem:[%s1924_s2] sm:$0xff]  }
  0x10   :  { %84 = vperm.xlu0 %1425, %v42_v13   ;;  %89 = vperm.xlu1 %1426, %v43_v16  }
  0x11   :  { %1376 = vmatprep.mubr.bf16.mxu1 %v1436_v43 }
  0x14   :  { %94 = vperm.xlu0 %1425, %v44_v17   ;;  %99 = vperm.xlu1 %1426, %v45_v18  }
  0x16   :  { %1353 = vmatmul.mubr.msk.bf16.gmra.mrb[8].mxu0 %vm178_vm0, %v1433_v14 }
  0x17   :  { %1356 = vmatprep.mubr.msk.bf16.mxu0 %vm178_vm0, %v1434_v15 }
  0x18   :  { %104 = vperm.xlu0 %1425, %v46_v19   ;;  %109 = vperm.xlu1 %1426, %v47_v21  }
  0x1c   :  { %114 = vperm.xlu0 %1425, %v48_v22   ;;  %119 = vperm.xlu1 %1426, %v49_v23  }
  0x1e   :  { %1357 = vmatmul.mubr.msk.bf16.gmra.mrb[12].mxu0 %vm178_vm0, %v1435_v20 }
  0x20   :  { %124 = vperm.xlu0 %1425, %v50_v24   ;;  %129 = vperm.xlu1 %1426, %v51_v25  }
  0x24   :  { %455 = vperm.xlu0 %1425, %v1221_v26   ;;  %460 = vperm.xlu1 %1426, %v1222_v27  }
  0x28   :  { %465 = vperm.xlu0 %1425, %v1223_v28   ;;  %470 = vperm.xlu1 %1426, %v1224_v29  }
  0x2c   :  { %475 = vperm.xlu0 %1425, %v1225_v30   ;;  %480 = vperm.xlu1 %1426, %v1226_v31  }
  0x30   :  { %485 = vperm.xlu0 %1425, %v1227_v32   ;;  %490 = vperm.xlu1 %1426, %v1228_v33  }
  0x34   :  { %495 = vperm.xlu0 %1425, %v1229_v34   ;;  %500 = vperm.xlu1 %1426, %v1230_v35  }
  0x38   :  { %505 = vperm.xlu0 %1425, %v1231_v36   ;;  %510 = vperm.xlu1 %1426, %v1232_v37  }
  0x3c   :  { %515 = vperm.xlu0 %1425, %v1233_v38   ;;  %520 = vperm.xlu1 %1426, %v1234_v39  }
  0x40   :  { %525 = vperm.xlu0 %1425, %v1235_v40   ;;  %530 = vperm.xlu1 %1426, %v1236_v41  }
  0x44   :  { %834 = vperm.xlu0 %1425, %v1277_v42  }
  0x83   :  { %v55_v44 = vpop.permute.xlu0 %54  ;;  %v65_v45 = vpop.permute.xlu1 %64 }
  0x87   :  { %v60_v46 = vpop.permute.xlu0 %59  ;;  %v70_v47 = vpop.permute.xlu1 %69 }
  0x8b   :  { %v75_v48 = vpop.permute.xlu0 %74  ;;  %v80_v49 = vpop.permute.xlu1 %79 }
  0x8f   :  { %v85_v50 = vpop.permute.xlu0 %84  ;;  %v90_v54 = vpop.permute.xlu1 %89 }
  0x93   :  { %v95_v63 = vpop.permute.xlu0 %94  ;;  %v100_v1 = vpop.permute.xlu1 %99 }
  0x97   :  { %v105_v10 = vpop.permute.xlu0 %104  ;;  %v110_v14 = vpop.permute.xlu1 %109 }
  0x9b   :  { %v115_v25 = vpop.permute.xlu0 %114  ;;  %v120_v33 = vpop.permute.xlu1 %119 }
  0x9f   :  { %v125_v40 = vpop.permute.xlu0 %124 }
  0xd9   :  { %v1346_v51 = vpop.f32.mrb[0].mxu0 }
  0xda   :  { %v1743_v52 = vadd.f32 %v1346_v51, %v65_v45  ;;  %v237_v53 = vpop.f32.mrb[1].mxu0 }
  0xdb   :  { %v1745_v55 = vadd.f32 %v237_v53, %v55_v44  ;;  %v1347_v56 = vpop.f32.mrb[2].mxu0 }
  0xdc   :  { %v1207_v57 = vmul.f32 -1.442695, %v1743_v52  ;;  %v1748_v58 = vadd.f32 %v1347_v56, %v70_v47  ;;  %v240_v59 = vpop.f32.mrb[3].mxu0 }
  0xdd   :  { %v1205_v60 = vmul.f32 -1.442695, %v1745_v55  ;;  %v1751_v61 = vadd.f32 %v240_v59, %v60_v46 }
  0xde   :  { %1452 = vpow2.f32 %v1207_v57  ;;  %v1208_v62 = vmul.f32 -1.442695, %v1748_v58 }
  0xdf   :  { %1454 = vpow2.f32 %v1205_v60  ;;  %v1206_v0 = vmul.f32 -1.442695, %v1751_v61 }
  0xe0   :  { %1456 = vpow2.f32 %v1208_v62 }
  0xe1   :  { %1458 = vpow2.f32 %v1206_v0  ;;  %v1350_v2 = vpop.f32.mrb[4].mxu0 }
  0xe2   :  { %v1755_v3 = vadd.f32 %v1350_v2, %v85_v50  ;;  %v253_v4 = vpop.f32.mrb[5].mxu0 }
  0xe3   :  { %v1757_v5 = vadd.f32 %v253_v4, %v75_v48  ;;  %v1351_v6 = vpop.f32.mrb[6].mxu0  ;;  %v130_v48 = vpop.permute.xlu1 %129 }
  0xe4   :  { %v1211_v7 = vmul.f32 -1.442695, %v1755_v3  ;;  %v1760_v8 = vadd.f32 %v1351_v6, %v90_v54  ;;  %v256_v9 = vpop.f32.mrb[7].mxu0 }
  0xe5   :  { %v1209_v11 = vmul.f32 -1.442695, %v1757_v5  ;;  %v1763_v12 = vadd.f32 %v256_v9, %v80_v49 }
  0xe6   :  { %1460 = vpow2.f32 %v1211_v7  ;;  %v1212_v13 = vmul.f32 -1.442695, %v1760_v8 }
  0xe7   :  { %1462 = vpow2.f32 %v1209_v11  ;;  %v1210_v15 = vmul.f32 -1.442695, %v1763_v12 }
  0xe8   :  { %v1453_v16 = vpop.eup %1452  ;;  %1464 = vpow2.f32 %v1212_v13 }
  0xe9   :  { %v1455_v17 = vpop.eup %1454  ;;  %v350_v18 = vadd.f32 1.0, %v1453_v16  ;;  %1466 = vpow2.f32 %v1210_v15  ;;  %v1354_v19 = vpop.f32.mrb[8].mxu0 }
  0xea   :  { %v1457_v20 = vpop.eup %1456  ;;  %v348_v21 = vadd.f32 1.0, %v1455_v17  ;;  %v1767_v22 = vadd.f32 %v1354_v19, %v105_v10  ;;  %v269_v23 = vpop.f32.mrb[9].mxu0 }
  0xeb   :  { %v1459_v24 = vpop.eup %1458  ;;  %1468 = vrcp.f32 %v350_v18  ;;  %v351_v26 = vadd.f32 1.0, %v1457_v20  ;;  %v1769_v27 = vadd.f32 %v269_v23, %v95_v63  ;;  %v1355_v28 = vpop.f32.mrb[10].mxu0 }
  0xec   :  { %1470 = vrcp.f32 %v348_v21  ;;  %v349_v29 = vadd.f32 1.0, %v1459_v24  ;;  %v1215_v30 = vmul.f32 -1.442695, %v1767_v22  ;;  %v1772_v31 = vadd.f32 %v1355_v28, %v110_v14  ;;  %v272_v32 = vpop.f32.mrb[11].mxu0 }
  0xed   :  { %1472 = vrcp.f32 %v351_v26  ;;  %v1213_v34 = vmul.f32 -1.442695, %v1769_v27  ;;  %v1775_v35 = vadd.f32 %v272_v32, %v100_v1 }
  0xee   :  { %1474 = vrcp.f32 %v349_v29  ;;  %v1216_v36 = vmul.f32 -1.442695, %v1772_v31 }
  0xef   :  { %1476 = vpow2.f32 %v1215_v30  ;;  %v1214_v37 = vmul.f32 -1.442695, %v1775_v35 }
  0xf0   :  { %v1461_v38 = vpop.eup %1460  ;;  %1478 = vpow2.f32 %v1213_v34 }
  0xf1   :  { %v1463_v39 = vpop.eup %1462  ;;  %v354_v41 = vadd.f32 1.0, %v1461_v38  ;;  %1480 = vpow2.f32 %v1216_v36  ;;  %v1358_v42 = vpop.f32.mrb[12].mxu0 }
  0xf2   :  { %v1465_v43 = vpop.eup %1464  ;;  %v352_v44 = vadd.f32 1.0, %v1463_v39  ;;  %1482 = vpow2.f32 %v1214_v37  ;;  %v1779_v45 = vadd.f32 %v1358_v42, %v125_v40  ;;  %v285_v46 = vpop.f32.mrb[13].mxu0 }
  0xf3   :  { %v1467_v47 = vpop.eup %1466  ;;  %1484 = vrcp.f32 %v354_v41  ;;  %v355_v49 = vadd.f32 1.0, %v1465_v43  ;;  %v1781_v50 = vadd.f32 %v285_v46, %v115_v25  ;;  %v1359_v51 = vpop.f32.mrb[14].mxu0 }
  0xf4   :  { %1486 = vrcp.f32 %v352_v44  ;;  %v353_v53 = vadd.f32 1.0, %v1467_v47  ;;  %v1219_v54 = vmul.f32 -1.442695, %v1779_v45  ;;  %v1784_v56 = vadd.f32 %v1359_v51, %v130_v48  ;;  %v288_v57 = vpop.f32.mrb[15].mxu0 }
  0xf5   :  { %v1469_v59 = vpop.eup %1468  ;;  %1488 = vrcp.f32 %v355_v49  ;;  %v1217_v60 = vmul.f32 -1.442695, %v1781_v50  ;;  %v1787_v62 = vadd.f32 %v288_v57, %v120_v33  ;;  %v1437_v57 = vld [vmem:[%s1924_s2 + $0x8] sm:$0xff]  }
  0xf6   :  { %v1471_v63 = vpop.eup %1470  ;;  %1490 = vrcp.f32 %v353_v53  ;;  %v1220_v0 = vmul.f32 -1.442695, %v1784_v56  ;;  %v398_v6 = vmul.f32 %v1469_v59, %v1743_v52  ;;  %v1441_v59 = vld [vmem:[%s1924_s2 + $0x28] sm:$0xff]  }
  0xf7   :  { %v1473_v1 = vpop.eup %1472  ;;  %1492 = vpow2.f32 %v1219_v54  ;;  %v1218_v2 = vmul.f32 -1.442695, %v1787_v62  ;;  %v396_v10 = vmul.f32 %v1471_v63, %v1745_v55  ;;  %v1444_v63 = vld [vmem:[%s1924_s2 + $0x40] sm:$0xff]  }
  0xf8   :  { %v1475_v4 = vpop.eup %1474  ;;  %v399_v7 = vmul.f32 %v1473_v1, %v1748_v58  ;;  %1494 = vpow2.f32 %v1217_v60  ;;  %v1442_v60 = vld [vmem:[%s1924_s2 + $0x30] sm:$0xff]   ;;  %1408 = vmatprep.mubr.bf16.mxu0 %v1444_v63  ;;  %v461_v1 = vpop.permute.xlu1 %460 }
  0xf9   :  { %v1477_v9 = vpop.eup %1476  ;;  %v397_v11 = vmul.f32 %v1475_v4, %v1751_v61  ;;  %1496 = vpow2.f32 %v1220_v0  ;;  %v456_v0 = vpop.permute.xlu0 %455 }
  0xfa   :  { %v1479_v13 = vpop.eup %1478  ;;  %v358_v14 = vadd.f32 1.0, %v1477_v9  ;;  %1498 = vpow2.f32 %v1218_v2  ;;  %v429_v15 = vpack.c.bf16 %v399_v7, %v398_v6 }
  0xfb   :  { %v1481_v16 = vpop.eup %1480  ;;  %v356_v17 = vadd.f32 1.0, %v1479_v13  ;;  %v428_v18 = vpack.c.bf16 %v397_v11, %v396_v10 }
  0xfc   :  { %v1483_v19 = vpop.eup %1482  ;;  %1500 = vrcp.f32 %v358_v14  ;;  %v359_v20 = vadd.f32 1.0, %v1481_v16  ;;  %v471_v4 = vpop.permute.xlu1 %470 }
  0xfd   :  { %v1485_v52 = vpop.eup %1484  ;;  %1502 = vrcp.f32 %v356_v17  ;;  %v357_v58 = vadd.f32 1.0, %v1483_v19  ;;  %1360 = vmatprep.subr.bf16.mxu1 %v428_v18  ;;  %v466_v2 = vpop.permute.xlu0 %465 }
  0xfe   :  { %v1487_v21 = vpop.eup %1486  ;;  %1504 = vrcp.f32 %v359_v20  ;;  %1361 = vmatpush3.bf16.msra.mxu1 %v428_v18  ;;  %v402_v23 = vmul.f32 %v1485_v52, %v1755_v3 }
  0xff   :  { %v1489_v55 = vpop.eup %1488  ;;  %1506 = vrcp.f32 %v357_v58  ;;  %1362 = vmatprep.subr.bf16.mxu1 %v429_v15  ;;  %v400_v26 = vmul.f32 %v1487_v21, %v1757_v5 }
 0x100   :  { %v1491_v61 = vpop.eup %1490  ;;  %v403_v24 = vmul.f32 %v1489_v55, %v1760_v8  ;;  %v481_v7 = vpop.permute.xlu1 %480 }
 0x101   :  { %v1493_v25 = vpop.eup %1492  ;;  %v401_v28 = vmul.f32 %v1491_v61, %v1763_v12  ;;  %v476_v6 = vpop.permute.xlu0 %475 }
 0x102   :  { %v1495_v29 = vpop.eup %1494  ;;  %v362_v30 = vadd.f32 1.0, %v1493_v25  ;;  %1363 = vmatpush3.bf16.msra.mxu1 %v429_v15  ;;  %v431_v32 = vpack.c.bf16 %v403_v24, %v402_v23 }
 0x103   :  { %v1497_v33 = vpop.eup %1496  ;;  %v360_v34 = vadd.f32 1.0, %v1495_v29  ;;  %v430_v36 = vpack.c.bf16 %v401_v28, %v400_v26 }
 0x104   :  { %v1499_v37 = vpop.eup %1498  ;;  %1508 = vrcp.f32 %v362_v30  ;;  %v363_v38 = vadd.f32 1.0, %v1497_v33  ;;  %v491_v14 = vpop.permute.xlu1 %490 }
 0x105   :  { %1510 = vrcp.f32 %v360_v34  ;;  %v361_v39 = vadd.f32 1.0, %v1499_v37  ;;  %1364 = vmatprep.subr.bf16.mxu1 %v430_v36  ;;  %v486_v9 = vpop.permute.xlu0 %485 }
 0x106   :  { %v1501_v3 = vpop.eup %1500  ;;  %1512 = vrcp.f32 %v363_v38  ;;  %1365 = vmatpush3.bf16.msra.mxu1 %v430_v36 }
 0x107   :  { %v1503_v8 = vpop.eup %1502  ;;  %1514 = vrcp.f32 %v361_v39  ;;  %1366 = vmatprep.subr.bf16.mxu1 %v431_v32  ;;  %v406_v40 = vmul.f32 %v1501_v3, %v1767_v22 }
 0x108   :  { %v1505_v5 = vpop.eup %1504  ;;  %v404_v42 = vmul.f32 %v1503_v8, %v1769_v27  ;;  %v501_v61 = vpop.permute.xlu1 %500 }
 0x109   :  { %v1507_v12 = vpop.eup %1506  ;;  %v407_v41 = vmul.f32 %v1505_v5, %v1772_v31  ;;  %v496_v21 = vpop.permute.xlu0 %495 }
 0x10a   :  { %v405_v43 = vmul.f32 %v1507_v12, %v1775_v35  ;;  %1367 = vmatpush3.bf16.msra.mxu1 %v431_v32 }
 0x10b   :  { %v433_v44 = vpack.c.bf16 %v407_v41, %v406_v40 }
 0x10c   :  { %v432_v46 = vpack.c.bf16 %v405_v43, %v404_v42  ;;  %v511_v38 = vpop.permute.xlu1 %510 }
 0x10d   :  { %v506_v33 = vpop.permute.xlu0 %505 }
 0x10e   :  { %v1509_v47 = vpop.eup %1508  ;;  %1368 = vmatprep.subr.bf16.mxu1 %v432_v46 }
 0x10f   :  { %v1511_v48 = vpop.eup %1510  ;;  %1369 = vmatpush3.bf16.msra.mxu1 %v432_v46  ;;  %v410_v53 = vmul.f32 %v1509_v47, %v1779_v45  ;;  %v1438_v45 = vld [vmem:[%s1924_s2 + $0x10] sm:$0xff]  }
 0x110   :  { %v1513_v49 = vpop.eup %1512  ;;  %1370 = vmatprep.subr.bf16.mxu1 %v433_v44  ;;  %v408_v31 = vmul.f32 %v1511_v48, %v1781_v50  ;;  %v1439_v50 = vld [vmem:[%s1924_s2 + $0x18] sm:$0xff]  }
 0x111   :  { %v1515_v51 = vpop.eup %1514  ;;  %v411_v22 = vmul.f32 %v1513_v49, %v1784_v56  ;;  %v1440_v56 = vld [vmem:[%s1924_s2 + $0x20] sm:$0xff]   ;;  %v516_v46 = vpop.permute.xlu0 %515 }
 0x112   :  { %v409_v27 = vmul.f32 %v1515_v51, %v1787_v62  ;;  %v1443_v62 = vld [vmem:[%s1924_s2 + $0x38] sm:$0xff]  }
 0x113   :  { %1371 = vmatpush3.bf16.msra.mxu1 %v433_v44  ;;  %v435_v35 = vpack.c.bf16 %v411_v22, %v410_v53 }
 0x114   :  { %v434_v54 = vpack.c.bf16 %v409_v27, %v408_v31  ;;  %v521_v27 = vpop.permute.xlu1 %520 }
 0x116   :  { %1372 = vmatprep.subr.bf16.mxu1 %v434_v54 }
 0x117   :  { %1373 = vmatpush3.bf16.msra.mxu1 %v434_v54 }
 0x118   :  { %1374 = vmatprep.subr.bf16.mxu1 %v435_v35 }
 0x11b   :  { %1375 = vmatpush3.bf16.msra.mxu1 %v435_v35 }
 0x11e   :  { %1377 = vmatmul.mubr.bf16.vlgmr.msra.gmra.mrb[0].mxu1 %v1437_v57 }
 0x11f   :  { %1380 = vmatprep.mubr.bf16.mxu1 %v1438_v45 }
 0x126   :  { %1381 = vmatmul.mubr.bf16.gmra.mrb[4].mxu1 %v1439_v50 }
 0x127   :  { %1384 = vmatprep.mubr.bf16.mxu1 %v1440_v56 }
 0x12e   :  { %1385 = vmatmul.mubr.bf16.gmra.mrb[8].mxu1 %v1441_v59  ;;  %v526_v59 = vpop.permute.xlu0 %525 }
 0x12f   :  { %1388 = vmatprep.mubr.bf16.mxu1 %v1442_v60 }
 0x136   :  { %1389 = vmatmul.mubr.bf16.gmra.mrb[12].mxu1 %v1443_v62 }
 0x1f1   :  { %v1378_v10 = vpop.f32.mrb[0].mxu1 }
 0x1f2   :  { %v1831_v11 = vadd.f32 %v1378_v10, %v466_v2  ;;  %v615_v13 = vpop.f32.mrb[1].mxu1 }
 0x1f3   :  { %v1833_v15 = vadd.f32 %v615_v13, %v456_v0  ;;  %v1379_v16 = vpop.f32.mrb[2].mxu1 }
 0x1f4   :  { %v1247_v17 = vmul.f32 -1.442695, %v1831_v11  ;;  %v1836_v18 = vadd.f32 %v1379_v16, %v471_v4  ;;  %v618_v19 = vpop.f32.mrb[3].mxu1 }
 0x1f5   :  { %v1245_v20 = vmul.f32 -1.442695, %v1833_v15  ;;  %v1839_v52 = vadd.f32 %v618_v19, %v461_v1 }
 0x1f6   :  { %1516 = vpow2.f32 %v1247_v17  ;;  %v1248_v58 = vmul.f32 -1.442695, %v1836_v18 }
 0x1f7   :  { %1518 = vpow2.f32 %v1245_v20  ;;  %v1246_v55 = vmul.f32 -1.442695, %v1839_v52 }
 0x1f8   :  { %1520 = vpow2.f32 %v1248_v58 }
 0x1f9   :  { %1522 = vpow2.f32 %v1246_v55  ;;  %v1382_v23 = vpop.f32.mrb[4].mxu1 }
 0x1fa   :  { %v1843_v24 = vadd.f32 %v1382_v23, %v486_v9  ;;  %v631_v25 = vpop.f32.mrb[5].mxu1 }
 0x1fb   :  { %v1845_v26 = vadd.f32 %v631_v25, %v476_v6  ;;  %v1383_v28 = vpop.f32.mrb[6].mxu1  ;;  %v531_v6 = vpop.permute.xlu1 %530 }
 0x1fc   :  { %v1251_v29 = vmul.f32 -1.442695, %v1843_v24  ;;  %v1848_v30 = vadd.f32 %v1383_v28, %v491_v14  ;;  %v634_v32 = vpop.f32.mrb[7].mxu1 }
 0x1fd   :  { %v1249_v34 = vmul.f32 -1.442695, %v1845_v26  ;;  %v1851_v36 = vadd.f32 %v634_v32, %v481_v7 }
 0x1fe   :  { %1524 = vpow2.f32 %v1251_v29  ;;  %v1252_v37 = vmul.f32 -1.442695, %v1848_v30 }
 0x1ff   :  { %1526 = vpow2.f32 %v1249_v34  ;;  %v1250_v39 = vmul.f32 -1.442695, %v1851_v36 }
 0x200   :  { %v1517_v3 = vpop.eup %1516  ;;  %1528 = vpow2.f32 %v1252_v37 }
 0x201   :  { %v1519_v8 = vpop.eup %1518  ;;  %v728_v5 = vadd.f32 1.0, %v1517_v3  ;;  %1530 = vpow2.f32 %v1250_v39  ;;  %v1386_v12 = vpop.f32.mrb[8].mxu1 }
 0x202   :  { %v1521_v40 = vpop.eup %1520  ;;  %v726_v41 = vadd.f32 1.0, %v1519_v8  ;;  %v1855_v42 = vadd.f32 %v1386_v12, %v506_v33  ;;  %v647_v43 = vpop.f32.mrb[9].mxu1 }
 0x203   :  { %v1523_v44 = vpop.eup %1522  ;;  %1532 = vrcp.f32 %v728_v5  ;;  %v729_v47 = vadd.f32 1.0, %v1521_v40  ;;  %v1857_v48 = vadd.f32 %v647_v43, %v496_v21  ;;  %v1387_v49 = vpop.f32.mrb[10].mxu1 }
 0x204   :  { %1534 = vrcp.f32 %v726_v41  ;;  %v727_v51 = vadd.f32 1.0, %v1523_v44  ;;  %v1255_v53 = vmul.f32 -1.442695, %v1855_v42  ;;  %v1860_v22 = vadd.f32 %v1387_v49, %v511_v38  ;;  %v650_v31 = vpop.f32.mrb[11].mxu1 }
 0x205   :  { %1536 = vrcp.f32 %v729_v47  ;;  %v1253_v35 = vmul.f32 -1.442695, %v1857_v48  ;;  %v1863_v54 = vadd.f32 %v650_v31, %v501_v61 }
 0x206   :  { %1538 = vrcp.f32 %v727_v51  ;;  %v1256_v57 = vmul.f32 -1.442695, %v1860_v22 }
 0x207   :  { %1540 = vpow2.f32 %v1255_v53  ;;  %v1254_v45 = vmul.f32 -1.442695, %v1863_v54 }
 0x208   :  { %v1525_v50 = vpop.eup %1524  ;;  %1542 = vpow2.f32 %v1253_v35 }
 0x209   :  { %v1527_v56 = vpop.eup %1526  ;;  %v732_v60 = vadd.f32 1.0, %v1525_v50  ;;  %1544 = vpow2.f32 %v1256_v57  ;;  %v1390_v62 = vpop.f32.mrb[12].mxu1 }
 0x20a   :  { %v1529_v63 = vpop.eup %1528  ;;  %v730_v0 = vadd.f32 1.0, %v1527_v56  ;;  %1546 = vpow2.f32 %v1254_v45  ;;  %v1867_v1 = vadd.f32 %v1390_v62, %v526_v59  ;;  %v663_v2 = vpop.f32.mrb[13].mxu1 }
 0x20b   :  { %v1531_v4 = vpop.eup %1530  ;;  %1548 = vrcp.f32 %v732_v60  ;;  %v733_v7 = vadd.f32 1.0, %v1529_v63  ;;  %v1869_v9 = vadd.f32 %v663_v2, %v516_v46  ;;  %v1391_v10 = vpop.f32.mrb[14].mxu1 }
 0x20c   :  { %1550 = vrcp.f32 %v730_v0  ;;  %v731_v13 = vadd.f32 1.0, %v1531_v4  ;;  %v1259_v14 = vmul.f32 -1.442695, %v1867_v1  ;;  %v1872_v16 = vadd.f32 %v1391_v10, %v531_v6  ;;  %v666_v17 = vpop.f32.mrb[15].mxu1 }
 0x20d   :  { %v1533_v19 = vpop.eup %1532  ;;  %1552 = vrcp.f32 %v733_v7  ;;  %v1257_v20 = vmul.f32 -1.442695, %v1869_v9  ;;  %v1875_v58 = vadd.f32 %v666_v17, %v521_v27  ;;  %v1445_v17 = vld [vmem:[%s1924_s2 + $0x48] sm:$0xff]  }
 0x20e   :  { %v1535_v21 = vpop.eup %1534  ;;  %1554 = vrcp.f32 %v731_v13  ;;  %v1260_v55 = vmul.f32 -1.442695, %v1872_v16  ;;  %v776_v28 = vmul.f32 %v1533_v19, %v1831_v11  ;;  %v1449_v19 = vld [vmem:[%s1924_s2 + $0x68] sm:$0xff]  }
 0x20f   :  { %v1537_v61 = vpop.eup %1536  ;;  %1556 = vpow2.f32 %v1259_v14  ;;  %v1258_v23 = vmul.f32 -1.442695, %v1875_v58  ;;  %v774_v33 = vmul.f32 %v1535_v21, %v1833_v15  ;;  %v1057_v21 = vlaneseq }
 0x210   :  { %v1539_v25 = vpop.eup %1538  ;;  %v777_v29 = vmul.f32 %v1537_v61, %v1836_v18  ;;  %1558 = vpow2.f32 %v1257_v20  ;;  %v1450_v20 = vld [vmem:[%s1924_s2 + $0x70] sm:$0xff]  }
 0x211   :  { %v1541_v32 = vpop.eup %1540  ;;  %v775_v34 = vmul.f32 %v1539_v25, %v1839_v52  ;;  %1560 = vpow2.f32 %v1260_v55  ;;  %v1058_v55 = vshrl.u32 %v1057_v21, 7 }
 0x212   :  { %v1543_v37 = vpop.eup %1542  ;;  %v736_v38 = vadd.f32 1.0, %v1541_v32  ;;  %1562 = vpow2.f32 %v1258_v23  ;;  %v808_v39 = vpack.c.bf16 %v777_v29, %v776_v28  ;;  %v835_v23 = vpop.permute.xlu0 %834 }
 0x213   :  { %v1545_v3 = vpop.eup %1544  ;;  %v734_v8 = vadd.f32 1.0, %v1543_v37  ;;  %v807_v5 = vpack.c.bf16 %v775_v34, %v774_v33  ;;  %vm1074_vm1 = vcmp.ge.s32.totalorder %v1058_v55, 1  ;;  %vm1090_vm2 = vcmp.lt.s32.totalorder %v1058_v55, 5 }
 0x214   :  { %v1547_v12 = vpop.eup %1546  ;;  %1564 = vrcp.f32 %v736_v38  ;;  %v737_v40 = vadd.f32 1.0, %v1545_v3  ;;  %vm1106_vm3 = vmand %vm1074_vm1, %vm1090_vm2 }
 0x215   :  { %v1549_v11 = vpop.eup %1548  ;;  %1566 = vrcp.f32 %v734_v8  ;;  %v735_v18 = vadd.f32 1.0, %v1547_v12  ;;  %1392 = vmatprep.subr.bf16.mxu0 %v807_v5 }
 0x216   :  { %v1551_v41 = vpop.eup %1550  ;;  %1568 = vrcp.f32 %v737_v40  ;;  %1393 = vmatpush3.bf16.msra.mxu0 %v807_v5  ;;  %v780_v43 = vmul.f32 %v1549_v11, %v1843_v24  ;;  %v1179_v5 = vsub.s32 0, %v1058_v55 }
 0x217   :  { %v1553_v15 = vpop.eup %1552  ;;  %1570 = vrcp.f32 %v735_v18  ;;  %1394 = vmatprep.subr.bf16.mxu0 %v808_v39  ;;  %v778_v47 = vmul.f32 %v1551_v41, %v1845_v26 }
 0x218   :  { %v1555_v52 = vpop.eup %1554  ;;  %v781_v44 = vmul.f32 %v1553_v15, %v1848_v30 }
 0x219   :  { %v1557_v46 = vpop.eup %1556  ;;  %v779_v49 = vmul.f32 %v1555_v52, %v1851_v36 }
 0x21a   :  { %v1559_v51 = vpop.eup %1558  ;;  %v740_v53 = vadd.f32 1.0, %v1557_v46  ;;  %1395 = vmatpush3.bf16.msra.mxu0 %v808_v39  ;;  %v810_v31 = vpack.c.bf16 %v781_v44, %v780_v43 }
 0x21b   :  { %v1561_v27 = vpop.eup %1560  ;;  %v738_v35 = vadd.f32 1.0, %v1559_v51  ;;  %v809_v57 = vpack.c.bf16 %v779_v49, %v778_v47 }
 0x21c   :  { %v1563_v45 = vpop.eup %1562  ;;  %1572 = vrcp.f32 %v740_v53  ;;  %v741_v50 = vadd.f32 1.0, %v1561_v27 }
 0x21d   :  { %1574 = vrcp.f32 %v738_v35  ;;  %v739_v56 = vadd.f32 1.0, %v1563_v45  ;;  %1396 = vmatprep.subr.bf16.mxu0 %v809_v57 }
 0x21e   :  { %v1565_v24 = vpop.eup %1564  ;;  %1576 = vrcp.f32 %v741_v50  ;;  %1397 = vmatpush3.bf16.msra.mxu0 %v809_v57 }
 0x21f   :  { %v1567_v30 = vpop.eup %1566  ;;  %1578 = vrcp.f32 %v739_v56  ;;  %1398 = vmatprep.subr.bf16.mxu0 %v810_v31  ;;  %v784_v59 = vmul.f32 %v1565_v24, %v1855_v42 }
 0x220   :  { %v1569_v26 = vpop.eup %1568  ;;  %v782_v62 = vmul.f32 %v1567_v30, %v1857_v48 }
 0x221   :  { %v1571_v36 = vpop.eup %1570  ;;  %v785_v60 = vmul.f32 %v1569_v26, %v1860_v22 }
 0x222   :  { %v783_v63 = vmul.f32 %v1571_v36, %v1863_v54  ;;  %1399 = vmatpush3.bf16.msra.mxu0 %v810_v31 }
 0x223   :  { %v812_v0 = vpack.c.bf16 %v785_v60, %v784_v59 }
 0x224   :  { %v811_v2 = vpack.c.bf16 %v783_v63, %v782_v62 }
 0x226   :  { %v1573_v4 = vpop.eup %1572  ;;  %1400 = vmatprep.subr.bf16.mxu0 %v811_v2 }
 0x227   :  { %v1575_v6 = vpop.eup %1574  ;;  %1401 = vmatpush3.bf16.msra.mxu0 %v811_v2  ;;  %v788_v13 = vmul.f32 %v1573_v4, %v1867_v1  ;;  %v1446_v1 = vld [vmem:[%s1924_s2 + $0x50] sm:$0xff]  }
 0x228   :  { %v1577_v7 = vpop.eup %1576  ;;  %1402 = vmatprep.subr.bf16.mxu0 %v812_v0  ;;  %v786_v22 = vmul.f32 %v1575_v6, %v1869_v9  ;;  %v1447_v9 = vld [vmem:[%s1924_s2 + $0x58] sm:$0xff]  }
 0x229   :  { %v1579_v10 = vpop.eup %1578  ;;  %v789_v42 = vmul.f32 %v1577_v7, %v1872_v16  ;;  %v1448_v16 = vld [vmem:[%s1924_s2 + $0x60] sm:$0xff]  }
 0x22a   :  { %v787_v48 = vmul.f32 %v1579_v10, %v1875_v58  ;;  %v1451_v58 = vld [vmem:[%s1924_s2 + $0x78] sm:$0xff]  }
 0x22b   :  { %1403 = vmatpush3.bf16.msra.mxu0 %v812_v0  ;;  %v814_v54 = vpack.c.bf16 %v789_v42, %v788_v13 }
 0x22c   :  { %v813_v14 = vpack.c.bf16 %v787_v48, %v786_v22 }
 0x22e   :  { %1404 = vmatprep.subr.bf16.mxu0 %v813_v14 }
 0x22f   :  { %1405 = vmatpush3.bf16.msra.mxu0 %v813_v14 }
 0x230   :  { %1406 = vmatprep.subr.bf16.mxu0 %v814_v54 }
 0x233   :  { %1407 = vmatpush3.bf16.msra.mxu0 %v814_v54 }
 0x236   :  { %1409 = vmatmul.mubr.bf16.vlgmr.msra.gmra.mrb[16].mxu0 %v1445_v17 }
 0x237   :  { %1412 = vmatprep.mubr.bf16.mxu0 %v1446_v1 }
 0x23e   :  { %1413 = vmatmul.mubr.bf16.gmra.mrb[20].mxu0 %v1447_v9 }
 0x23f   :  { %1416 = vmatprep.mubr.bf16.mxu0 %v1448_v16 }
 0x246   :  { %1417 = vmatmul.mubr.bf16.gmra.mrb[24].mxu0 %v1449_v19 }
 0x247   :  { %1420 = vmatprep.mubr.bf16.mxu0 %v1450_v20 }
 0x24e   :  { %1421 = vmatmul.mubr.bf16.gmra.mrb[28].mxu0 %v1451_v58 }
 0x309   :  { %v1410_v61 = vpop.f32.mrb[16].mxu0 }
 0x30a   :  { %v994_v25 = vpop.f32.mrb[17].mxu0 }
 0x30b   :  { %v995_v28 = vadd.f32 %v994_v25, %v835_v23  ;;  %v1411_v29 = vpop.f32.mrb[18].mxu0 }
 0x30c   :  { %v997_v32 = vpop.f32.mrb[19].mxu0 }
 0x30d   :  { %v1122_v33 = vsel %vm1106_vm3, %v995_v28, 0.0  ;;  %v1180_v41 = vrot.slane %v995_v28, %v1179_v5 }
 0x30e   :  { %v1139_v34 = vsel %vm1138_vm4, %v1122_v33, 0.0 }
 0x30f   :  { %v1170_v37 = vrot.slane %v1139_v34, 4  ;;  %v1181_v46 = vadd.f32 %v1180_v41, %v995_v28 }
 0x311   :  { %v1171_v38 = vadd.f32 %v1170_v37, %v1139_v34  ;;  %v1414_v39 = vpop.f32.mrb[20].mxu0 }
 0x312   :  { %v1010_v3 = vpop.f32.mrb[21].mxu0 }
 0x313   :  { %v1172_v8 = vrot.slane %v1171_v38, 2  ;;  %v1415_v12 = vpop.f32.mrb[22].mxu0 }
 0x314   :  { %v1013_v40 = vpop.f32.mrb[23].mxu0 }
 0x315   :  { %v1173_v11 = vadd.f32 %v1172_v8, %v1171_v38 }
 0x317   :  { %v1174_v18 = vrot.slane %v1173_v11, 1 }
 0x319   :  { %v1175_v15 = vadd.f32 %v1174_v18, %v1173_v11  ;;  %v1418_v52 = vpop.f32.mrb[24].mxu0 }
 0x31a   :  { %v1026_v43 = vpop.f32.mrb[25].mxu0 }
 0x31b   :  { %v1176_v44 = vmul.f32 0.25, %v1175_v15  ;;  %v1419_v47 = vpop.f32.mrb[26].mxu0 }
 0x31c   :  { %v1029_v49 = vpop.f32.mrb[27].mxu0 }
 0x31d   :  { %v1182_v51 = vsub.f32 %v1181_v46, %v1176_v44 }
 0x31f   :  { %1183 = vst.msk [vmem:[%s1925_s4] sm:$0xff] %vm1138_vm4, %v1182_v51 }
 0x321   :  { %v1422_v53 = vpop.f32.mrb[28].mxu0 }
 0x322   :  { %v1042_v31 = vpop.f32.mrb[29].mxu0 }
 0x323   :  { %v1423_v27 = vpop.f32.mrb[30].mxu0 }
 0x324   :  { %v1045_v35 = vpop.f32.mrb[31].mxu0 }

</bundles_post_ra>
